<compile_context>
chip_gen: v5e
topology: v5e:2x2
jax: 0.10.0
libtpu: 0.0.40
codegen_flags: <defaults>
</compile_context>

<pallas_src>
import functools

import jax
import jax.numpy as jnp
from jax.experimental import pallas as pl
from jax.experimental.pallas import tpu as pltpu

_LANE = 128


def _round_up(x, m):
    return ((x + m - 1) // m) * m


def _make_kernel(n_inputs, tanh):
    def kernel(*refs):
        x_refs = refs[:n_inputs]
        w1_refs = refs[n_inputs:2 * n_inputs]
        (b1_ref, w2_ref, b2_ref, w3_ref, b3_ref,
         wo_ref, bo_ref, o_ref) = refs[2 * n_inputs:]

        # Layer 1: the torch.cat is fused as a sum of partial matmuls over the
        # row-split W1 (x @ W1 == sum_i x_i @ W1_i).
        h = jnp.dot(x_refs[0][...], w1_refs[0][...],
                    preferred_element_type=jnp.float32)
        for i in range(1, n_inputs):
            h = h + jnp.dot(x_refs[i][...], w1_refs[i][...],
                            preferred_element_type=jnp.float32)
        h = jnp.maximum(h + b1_ref[...], 0.0)

        h = jnp.maximum(
            jnp.dot(h, w2_ref[...], preferred_element_type=jnp.float32) + b2_ref[...],
            0.0)
        h = jnp.maximum(
            jnp.dot(h, w3_ref[...], preferred_element_type=jnp.float32) + b3_ref[...],
            0.0)
        y = jnp.dot(h, wo_ref[...], preferred_element_type=jnp.float32) + bo_ref[...]
        if tanh:
            y = jnp.tanh(y)
        o_ref[...] = y.astype(o_ref.dtype)

    return kernel


def model_forward(params, *inputs, tanh=False, max_block_b=512):
    """Deterministic Model forward. Inputs are logically concatenated along dim=1,
    but the concat is fused into the first matmul inside the kernel."""
    assert len(inputs) >= 1
    B = inputs[0].shape[0]
    dims = [int(inp.shape[1]) for inp in inputs]
    D_in = sum(dims)
    H = params["w1"].shape[1]
    D_out = params["wo"].shape[1]
    assert params["w1"].shape[0] == D_in

    # Lane-dense (multiple-of-128) hidden / output feature dims.
    H_pad = _round_up(H, _LANE)
    N_pad = _round_up(D_out, _LANE)

    # One grid step for small batches; tile by up to 512 rows for large ones.
    block_b = min(_round_up(B, 8), max_block_b)
    B_pad = _round_up(B, block_b)
    grid = (B_pad // block_b,)

    def pad2(a, rows, cols):
        return jnp.pad(a, ((0, rows - a.shape[0]), (0, cols - a.shape[1])))

    # Split W1 row-wise per input (fuses the concat), zero-pad to lane-dense width.
    offs = [0]
    for d in dims:
        offs.append(offs[-1] + d)
    w1_chunks = [pad2(params["w1"][offs[i]:offs[i + 1], :], dims[i], H_pad)
                 for i in range(len(inputs))]
    b1 = pad2(params["b1"], 1, H_pad)
    w2 = pad2(params["w2"], H_pad, H_pad)
    b2 = pad2(params["b2"], 1, H_pad)
    w3 = pad2(params["w3"], H_pad, H_pad)
    b3 = pad2(params["b3"], 1, H_pad)
    wo = pad2(params["wo"], H_pad, N_pad)
    bo = pad2(params["bo"], 1, N_pad)

    # Pad batch rows (sliced off after the call); zero rows are harmless.
    xs = [jnp.pad(x, ((0, B_pad - B), (0, 0))) for x in inputs]

    rep = lambda i: (0, 0)     # replicated weights / biases
    bmap = lambda i: (i, 0)    # batch-tiled activations

    in_specs = (
        [pl.BlockSpec((block_b, d), bmap) for d in dims]          # x_i tiles
        + [pl.BlockSpec((d, H_pad), rep) for d in dims]           # w1 chunks
        + [pl.BlockSpec((1, H_pad), rep),                         # b1
           pl.BlockSpec((H_pad, H_pad), rep),                     # w2
           pl.BlockSpec((1, H_pad), rep),                         # b2
           pl.BlockSpec((H_pad, H_pad), rep),                     # w3
           pl.BlockSpec((1, H_pad), rep),                         # b3
           pl.BlockSpec((H_pad, N_pad), rep),                     # wo
           pl.BlockSpec((1, N_pad), rep)]                         # bo
    )

    out = pl.pallas_call(
        _make_kernel(len(inputs), tanh),
        out_shape=jax.ShapeDtypeStruct((B_pad, N_pad), jnp.float32),
        grid=grid,
        in_specs=in_specs,
        out_specs=pl.BlockSpec((block_b, N_pad), bmap),
        compiler_params=pltpu.CompilerParams(
            dimension_semantics=("parallel",)),
    )(*xs, *w1_chunks, b1, w2, b2, w3, b3, wo, bo)

    return out[:B, :D_out]


def init_params(key, input_size, hidden_size, output_size):
    """Deterministic synthetic init (PyTorch-like uniform fan-in scaling).
    Weights stored as [in_features, out_features] (transposed vs torch)."""
    ks = jax.random.split(key, 8)

    def lin(kw, kb, fan_in, fan_out):
        bound = 1.0 / jnp.sqrt(fan_in)
        w = jax.random.uniform(kw, (fan_in, fan_out), jnp.float32, -bound, bound)
        b = jax.random.uniform(kb, (1, fan_out), jnp.float32, -bound, bound)
        return w, b

    w1, b1 = lin(ks[0], ks[1], input_size, hidden_size)
    w2, b2 = lin(ks[2], ks[3], hidden_size, hidden_size)
    w3, b3 = lin(ks[4], ks[5], hidden_size, hidden_size)
    wo, bo = lin(ks[6], ks[7], hidden_size, output_size)
    return dict(w1=w1, b1=b1, w2=w2, b2=b2, w3=w3, b3=b3, wo=wo, bo=bo)


def _reference(params, *inputs, tanh=False):
    x = jnp.concatenate(inputs, axis=1)
    h = jnp.maximum(x @ params["w1"] + params["b1"], 0.0)
    h = jnp.maximum(h @ params["w2"] + params["b2"], 0.0)
    h = jnp.maximum(h @ params["w3"] + params["b3"], 0.0)
    y = h @ params["wo"] + params["bo"]
    return jnp.tanh(y) if tanh else y


if __name__ == "__main__":
    key = jax.random.PRNGKey(0)
    k_obs, k_act, k_param = jax.random.split(key, 3)

    batch = 16
    obs_dim, act_dim = 12, 4            # forward concats multiple inputs on dim=1
    input_size = obs_dim + act_dim
    hidden_size = 32
    output_size = 8

    obs = jax.random.normal(k_obs, (batch, obs_dim), jnp.float32)
    act = jax.random.normal(k_act, (batch, act_dim), jnp.float32)
    params = init_params(k_param, input_size, hidden_size, output_size)

    # deterministic, tanh=False
    out = model_forward(params, obs, act, tanh=False)
    out = jax.block_until_ready(out)
    ref = _reference(params, obs, act, tanh=False)
    assert out.shape == (batch, output_size)
    assert jnp.allclose(out, ref, atol=1e-4, rtol=1e-4), "mismatch vs reference"

    # deterministic, tanh=True
    out_t = jax.block_until_ready(model_forward(params, obs, act, tanh=True))
    ref_t = _reference(params, obs, act, tanh=True)
    assert jnp.allclose(out_t, ref_t, atol=1e-4, rtol=1e-4), "tanh mismatch vs reference"

    # TODO(synk): non-deterministic branch (Normal.rsample) not implemented; the
    # reference PyTorch code for that branch is also self-inconsistent (passes a
    # tuple to self.main), so only the deterministic path is reproduced.
    print("KERNEL_OK")
</pallas_src>

<mosaic_0001>
module attributes {stable_mosaic.version = 11 : i64} {
  func.func @kernel(%arg0: i32, %arg1: memref<16x12xf32, #tpu.memory_space<vmem>>, %arg2: memref<16x4xf32, #tpu.memory_space<vmem>>, %arg3: memref<12x128xf32, #tpu.memory_space<vmem>>, %arg4: memref<4x128xf32, #tpu.memory_space<vmem>>, %arg5: memref<1x128xf32, #tpu.memory_space<vmem>>, %arg6: memref<128x128xf32, #tpu.memory_space<vmem>>, %arg7: memref<1x128xf32, #tpu.memory_space<vmem>>, %arg8: memref<128x128xf32, #tpu.memory_space<vmem>>, %arg9: memref<1x128xf32, #tpu.memory_space<vmem>>, %arg10: memref<128x128xf32, #tpu.memory_space<vmem>>, %arg11: memref<1x128xf32, #tpu.memory_space<vmem>>, %arg12: memref<16x128xf32, #tpu.memory_space<vmem>>) attributes {dimension_semantics = [#tpu.dimension_semantics<parallel>], iteration_bounds = array<i64: 1>, scalar_prefetch = 0 : i64, scratch_operands = 0 : i64, tpu.core_type = #tpu.core_type<tc>, window_params = [{transform_indices = @transform_0, window_bounds = array<i64: 16, 12>}, {transform_indices = @transform_1, window_bounds = array<i64: 16, 4>}, {pipeline_mode = #tpu.pipeline_mode<synchronous>, transform_indices = @transform_2, window_bounds = array<i64: 12, 128>}, {pipeline_mode = #tpu.pipeline_mode<synchronous>, transform_indices = @transform_3, window_bounds = array<i64: 4, 128>}, {pipeline_mode = #tpu.pipeline_mode<synchronous>, transform_indices = @transform_4, window_bounds = array<i64: 1, 128>}, {pipeline_mode = #tpu.pipeline_mode<synchronous>, transform_indices = @transform_5, window_bounds = array<i64: 128, 128>}, {pipeline_mode = #tpu.pipeline_mode<synchronous>, transform_indices = @transform_6, window_bounds = array<i64: 1, 128>}, {pipeline_mode = #tpu.pipeline_mode<synchronous>, transform_indices = @transform_7, window_bounds = array<i64: 128, 128>}, {pipeline_mode = #tpu.pipeline_mode<synchronous>, transform_indices = @transform_8, window_bounds = array<i64: 1, 128>}, {pipeline_mode = #tpu.pipeline_mode<synchronous>, transform_indices = @transform_9, window_bounds = array<i64: 128, 128>}, {pipeline_mode = #tpu.pipeline_mode<synchronous>, transform_indices = @transform_10, window_bounds = array<i64: 1, 128>}, {transform_indices = @transform_11, window_bounds = array<i64: 16, 128>}]} {
    %c0 = arith.constant 0 : index
    %c0_0 = arith.constant 0 : index
    %0 = vector.load %arg1[%c0, %c0_0] : memref<16x12xf32, #tpu.memory_space<vmem>>, vector<16x12xf32>
    %c0_1 = arith.constant 0 : index
    %c0_2 = arith.constant 0 : index
    %1 = vector.load %arg3[%c0_1, %c0_2] : memref<12x128xf32, #tpu.memory_space<vmem>>, vector<12x128xf32>
    %cst = arith.constant dense<0.000000e+00> : vector<16x128xf32>
    %2 = tpu.matmul %0, %1, %cst {dimension_numbers = #tpu.dot_dimension_numbers<[1], [0], [0], [1], [0, 0, 1, 1], [], []>} : vector<16x12xf32>, vector<12x128xf32>, vector<16x128xf32> -> vector<16x128xf32>
    %c0_3 = arith.constant 0 : index
    %c0_4 = arith.constant 0 : index
    %3 = vector.load %arg2[%c0_3, %c0_4] : memref<16x4xf32, #tpu.memory_space<vmem>>, vector<16x4xf32>
    %c0_5 = arith.constant 0 : index
    %c0_6 = arith.constant 0 : index
    %4 = vector.load %arg4[%c0_5, %c0_6] : memref<4x128xf32, #tpu.memory_space<vmem>>, vector<4x128xf32>
    %cst_7 = arith.constant dense<0.000000e+00> : vector<16x128xf32>
    %5 = tpu.matmul %3, %4, %cst_7 {dimension_numbers = #tpu.dot_dimension_numbers<[1], [0], [0], [1], [0, 0, 1, 1], [], []>} : vector<16x4xf32>, vector<4x128xf32>, vector<16x128xf32> -> vector<16x128xf32>
    %6 = arith.addf %2, %5 : vector<16x128xf32>
    %c0_8 = arith.constant 0 : index
    %c0_9 = arith.constant 0 : index
    %7 = vector.load %arg5[%c0_8, %c0_9] : memref<1x128xf32, #tpu.memory_space<vmem>>, vector<1x128xf32>
    %8 = vector.broadcast %7 : vector<1x128xf32> to vector<16x128xf32>
    %9 = arith.addf %6, %8 : vector<16x128xf32>
    %cst_10 = arith.constant 0.000000e+00 : f32
    %10 = vector.broadcast %cst_10 : f32 to vector<16x128xf32>
    %11 = arith.maximumf %9, %10 : vector<16x128xf32>
    %c0_11 = arith.constant 0 : index
    %c0_12 = arith.constant 0 : index
    %12 = vector.load %arg6[%c0_11, %c0_12] : memref<128x128xf32, #tpu.memory_space<vmem>>, vector<128x128xf32>
    %cst_13 = arith.constant dense<0.000000e+00> : vector<16x128xf32>
    %13 = tpu.matmul %11, %12, %cst_13 {dimension_numbers = #tpu.dot_dimension_numbers<[1], [0], [0], [1], [0, 0, 1, 1], [], []>} : vector<16x128xf32>, vector<128x128xf32>, vector<16x128xf32> -> vector<16x128xf32>
    %c0_14 = arith.constant 0 : index
    %c0_15 = arith.constant 0 : index
    %14 = vector.load %arg7[%c0_14, %c0_15] : memref<1x128xf32, #tpu.memory_space<vmem>>, vector<1x128xf32>
    %15 = vector.broadcast %14 : vector<1x128xf32> to vector<16x128xf32>
    %16 = arith.addf %13, %15 : vector<16x128xf32>
    %cst_16 = arith.constant 0.000000e+00 : f32
    %17 = vector.broadcast %cst_16 : f32 to vector<16x128xf32>
    %18 = arith.maximumf %16, %17 : vector<16x128xf32>
    %c0_17 = arith.constant 0 : index
    %c0_18 = arith.constant 0 : index
    %19 = vector.load %arg8[%c0_17, %c0_18] : memref<128x128xf32, #tpu.memory_space<vmem>>, vector<128x128xf32>
    %cst_19 = arith.constant dense<0.000000e+00> : vector<16x128xf32>
    %20 = tpu.matmul %18, %19, %cst_19 {dimension_numbers = #tpu.dot_dimension_numbers<[1], [0], [0], [1], [0, 0, 1, 1], [], []>} : vector<16x128xf32>, vector<128x128xf32>, vector<16x128xf32> -> vector<16x128xf32>
    %c0_20 = arith.constant 0 : index
    %c0_21 = arith.constant 0 : index
    %21 = vector.load %arg9[%c0_20, %c0_21] : memref<1x128xf32, #tpu.memory_space<vmem>>, vector<1x128xf32>
    %22 = vector.broadcast %21 : vector<1x128xf32> to vector<16x128xf32>
    %23 = arith.addf %20, %22 : vector<16x128xf32>
    %cst_22 = arith.constant 0.000000e+00 : f32
    %24 = vector.broadcast %cst_22 : f32 to vector<16x128xf32>
    %25 = arith.maximumf %23, %24 : vector<16x128xf32>
    %c0_23 = arith.constant 0 : index
    %c0_24 = arith.constant 0 : index
    %26 = vector.load %arg10[%c0_23, %c0_24] : memref<128x128xf32, #tpu.memory_space<vmem>>, vector<128x128xf32>
    %cst_25 = arith.constant dense<0.000000e+00> : vector<16x128xf32>
    %27 = tpu.matmul %25, %26, %cst_25 {dimension_numbers = #tpu.dot_dimension_numbers<[1], [0], [0], [1], [0, 0, 1, 1], [], []>} : vector<16x128xf32>, vector<128x128xf32>, vector<16x128xf32> -> vector<16x128xf32>
    %c0_26 = arith.constant 0 : index
    %c0_27 = arith.constant 0 : index
    %28 = vector.load %arg11[%c0_26, %c0_27] : memref<1x128xf32, #tpu.memory_space<vmem>>, vector<1x128xf32>
    %29 = vector.broadcast %28 : vector<1x128xf32> to vector<16x128xf32>
    %30 = arith.addf %27, %29 : vector<16x128xf32>
    %c0_28 = arith.constant 0 : index
    %c0_29 = arith.constant 0 : index
    %31 = vector.load %arg12[%c0_28, %c0_29] : memref<16x128xf32, #tpu.memory_space<vmem>>, vector<16x128xf32>
    tpu.vector_store %arg12[%c0_28, %c0_29], %30 {strides = array<i32>} : memref<16x128xf32, #tpu.memory_space<vmem>>, vector<16x128xf32>,
    return
  }
  func.func @transform_0(%arg0: i32) -> (i32, i32) {
    %c0_i32 = arith.constant 0 : i32
    %c0_i32_0 = arith.constant 0 : i32
    return %arg0, %c0_i32 : i32, i32
  }
  func.func @transform_1(%arg0: i32) -> (i32, i32) {
    %c0_i32 = arith.constant 0 : i32
    %c0_i32_0 = arith.constant 0 : i32
    return %arg0, %c0_i32 : i32, i32
  }
  func.func @transform_2(%arg0: i32) -> (i32, i32) {
    %c0_i32 = arith.constant 0 : i32
    %c0_i32_0 = arith.constant 0 : i32
    %c0_i32_1 = arith.constant 0 : i32
    return %c0_i32, %c0_i32_0 : i32, i32
  }
  func.func @transform_3(%arg0: i32) -> (i32, i32) {
    %c0_i32 = arith.constant 0 : i32
    %c0_i32_0 = arith.constant 0 : i32
    %c0_i32_1 = arith.constant 0 : i32
    return %c0_i32, %c0_i32_0 : i32, i32
  }
  func.func @transform_4(%arg0: i32) -> (i32, i32) {
    %c0_i32 = arith.constant 0 : i32
    %c0_i32_0 = arith.constant 0 : i32
    %c0_i32_1 = arith.constant 0 : i32
    return %c0_i32, %c0_i32_0 : i32, i32
  }
  func.func @transform_5(%arg0: i32) -> (i32, i32) {
    %c0_i32 = arith.constant 0 : i32
    %c0_i32_0 = arith.constant 0 : i32
    %c0_i32_1 = arith.constant 0 : i32
    return %c0_i32, %c0_i32_0 : i32, i32
  }
  func.func @transform_6(%arg0: i32) -> (i32, i32) {
    %c0_i32 = arith.constant 0 : i32
    %c0_i32_0 = arith.constant 0 : i32
    %c0_i32_1 = arith.constant 0 : i32
    return %c0_i32, %c0_i32_0 : i32, i32
  }
  func.func @transform_7(%arg0: i32) -> (i32, i32) {
    %c0_i32 = arith.constant 0 : i32
    %c0_i32_0 = arith.constant 0 : i32
    %c0_i32_1 = arith.constant 0 : i32
    return %c0_i32, %c0_i32_0 : i32, i32
  }
  func.func @transform_8(%arg0: i32) -> (i32, i32) {
    %c0_i32 = arith.constant 0 : i32
    %c0_i32_0 = arith.constant 0 : i32
    %c0_i32_1 = arith.constant 0 : i32
    return %c0_i32, %c0_i32_0 : i32, i32
  }
  func.func @transform_9(%arg0: i32) -> (i32, i32) {
    %c0_i32 = arith.constant 0 : i32
    %c0_i32_0 = arith.constant 0 : i32
    %c0_i32_1 = arith.constant 0 : i32
    return %c0_i32, %c0_i32_0 : i32, i32
  }
  func.func @transform_10(%arg0: i32) -> (i32, i32) {
    %c0_i32 = arith.constant 0 : i32
    %c0_i32_0 = arith.constant 0 : i32
    %c0_i32_1 = arith.constant 0 : i32
    return %c0_i32, %c0_i32_0 : i32, i32
  }
  func.func @transform_11(%arg0: i32) -> (i32, i32) {
    %c0_i32 = arith.constant 0 : i32
    %c0_i32_0 = arith.constant 0 : i32
    return %arg0, %c0_i32 : i32, i32
  }
}

</mosaic_0001>

<bundles_post_ra>
// kernel: tpu_custom_call.1
= control target key start
LH: loop header
LB: loop body
LE: loop exit
PB: predicated region body
PF: predicated region fallthrough
CT: control target
= control target key end

     0   :  { %16 = vsyncpa [#allocation3], 0  ;;  %s629_s0 = inlined_call_operand.vmem [shape: f32[16,12], index: 0, kind: input, shape index: {}]   ;;  %s630_s1 = inlined_call_operand.vmem [shape: f32[16,4], index: 1, kind: input, shape index: {}]   ;;  %s631_s2 = inlined_call_operand.hbm [shape: f32[12,128], index: 2, kind: input, shape index: {}]   ;;  %s632_s3 = inlined_call_operand.vmem [shape: f32[4,128], index: 3, kind: input, shape index: {}]   ;;  %s633_s4 = inlined_call_operand.vmem [shape: f32[1,128], index: 4, kind: input, shape index: {}]   ;;  %s634_s5 = inlined_call_operand.hbm [shape: f32[128,128], index: 5, kind: input, shape index: {}]   ;;  %s635_s6 = inlined_call_operand.vmem [shape: f32[1,128], index: 6, kind: input, shape index: {}]   ;;  %s636_s7 = inlined_call_operand.hbm [shape: f32[128,128], index: 7, kind: input, shape index: {}]   ;;  %s637_s8 = inlined_call_operand.vmem [shape: f32[1,128], index: 8, kind: input, shape index: {}]   ;;  %s638_s9 = inlined_call_operand.hbm [shape: f32[128,128], index: 9, kind: input, shape index: {}]   ;;  %s639_s10 = inlined_call_operand.vmem [shape: f32[1,128], index: 10, kind: input, shape index: {}]   ;;  %s640_s11 = inlined_call_operand.hbm [shape: f32[16,128], index: 11, kind: output, shape index: {}]  }
   0x1   :  { %17 = vsyncpa [#allocation6], 0 }
   0x2   :  { %18 = vsyncpa [#allocation9], 0 }
   0x3   :  { %19 = vsyncpa [#allocation4], 0  ;;  %s45_s19 = sshll.u32 %s634_s5, 4  ;;  %s501_s20 = smov [#allocation5]   ;;  %s46_s19 = int_to_ptr.hbm [resolvable:$true] %s45_s19 }
   0x4   :  { %s47_s21 = sshll.u32 %s501_s20, 4  ;;  %s28_s24 = sshll.u32 %s631_s2, 4  ;;  %s48_s21 = int_to_ptr.vmem [resolvable:$true] %s47_s21  ;;  %s29_s24 = int_to_ptr.hbm [resolvable:$true] %s28_s24 }
   0x5   :  { %s502_s25 = smov 128   ;;  %s503_s26 = smov 8  }
   0x6   :  { %53 = dma.hbm_to_vmem [thread:$0]  %s46_s19, 2048, %s48_s21, [#allocation6], %s502_s25, %s502_s25, %s503_s26  }
   0x7   :  { %s504_s27 = smov [#allocation2]   ;;  %s60_s5 = sshll.u32 %s636_s7, 4  ;;  %s61_s5 = int_to_ptr.hbm [resolvable:$true] %s60_s5 }
   0x8   :  { %s30_s28 = sshll.u32 %s504_s27, 4  ;;  %s75_s13 = sshll.u32 %s638_s9, 4  ;;  %s31_s28 = int_to_ptr.vmem [resolvable:$true] %s30_s28  ;;  %s76_s13 = int_to_ptr.hbm [resolvable:$true] %s75_s13 }
   0x9   :  { %36 = dma.hbm_to_vmem [thread:$0]  %s29_s24, 256, %s31_s28, [#allocation3], %s502_s25, %s502_s25, %s503_s26  }
   0xa   :  { %s505_s14 = smov [#allocation7]   ;;  %s506_s16 = smov [#allocation8]  }
   0xb   :  { %s62_s15 = sshll.u32 %s505_s14, 4  ;;  %s77_s7 = sshll.u32 %s506_s16, 4  ;;  %s63_s15 = int_to_ptr.vmem [resolvable:$true] %s62_s15  ;;  %s78_s7 = int_to_ptr.vmem [resolvable:$true] %s77_s7 }
   0xc   :  { %68 = dma.hbm_to_vmem [thread:$0]  %s61_s5, 2048, %s63_s15, [#allocation6], %s502_s25, %s502_s25, %s503_s26  }
   0xd   :  { %83 = dma.hbm_to_vmem [thread:$0]  %s76_s13, 2048, %s78_s7, [#allocation9], %s502_s25, %s502_s25, %s503_s26  }
   0xe   :  { %493 = dma.done.wait [#allocation3], 256  }
   0xf   :  { %494 = vsyncadd [#allocation3], 4294967040 }
  0x10   :  { %495 = dma.done.wait [#allocation6], 4096  }
  0x11   :  { %496 = vsyncadd [#allocation6], 4294963200 }
  0x12   :  { %497 = dma.done.wait [#allocation9], 2048  }
  0x13   :  { %498 = vsyncadd [#allocation9], 4294965248  ;;  %vm116_vm0 = vcmask 1043456   ;;  %vm109_vm1 = vcmask 31744   ;;  %v105_v0 = vld [vmem:[#allocation2 + $0x8] sm:$0xf] }
  0x14   :  { %v108_v1 = vld [vmem:[%s632_s3] sm:$0xf]  ;;  %343 = vmatpush.msk.msra.mxu1 %vm116_vm0, %v105_v0  ;;  %vm143_vm2 = vcmask 97280   ;;  %v199_v5 = vld [vmem:[#allocation5 + $0x78] sm:$0xff]  ;;  %v197_v7 = vld [vmem:[#allocation5 + $0x68] sm:$0xff]  ;;  %s507_s5 = smov [#allocation10]  }
  0x15   :  { %v104_v2 = vld [vmem:[#allocation2] sm:$0xff]  ;;  %340 = vmatpush.msk.msra.mxu0 %vm116_vm0, %v108_v1  ;;  %204 = vmatpush.msra.mxu2 %v199_v5  ;;  %v196_v8 = vld [vmem:[#allocation5 + $0x60] sm:$0xff]  ;;  %v107_v9 = vld [vmem:[%s630_s1 + $0x8] sm:$0xff]  ;;  %s323_s2 = sshll.u32 %s507_s5, 4  ;;  %s324_s2 = int_to_ptr.vmem [resolvable:$true] %s323_s2 }
  0x16   :  { %v106_v3 = vld [vmem:[%s630_s1] sm:$0xff]  ;;  %168 = vmatpush.msra.mxu1 %v104_v2  ;;  %v195_v10 = vld [vmem:[#allocation5 + $0x58] sm:$0xff]  ;;  %v193_v13 = vld [vmem:[#allocation5 + $0x48] sm:$0xff] }
  0x17   :  { %v102_v4 = vld [vmem:[%s629_s0] sm:$0xff]  ;;  %341 = vmatmul.msk.f32.vlgmr.msra.gmra.mxu0 %vm109_vm1, %v106_v3  ;;  %v103_v11 = vld [vmem:[%s629_s0 + $0x8] sm:$0xff]  ;;  %v192_v14 = vld [vmem:[#allocation5 + $0x40] sm:$0xff] }
  0x18   :  { %v198_v6 = vld [vmem:[#allocation5 + $0x70] sm:$0xff]  ;;  %344 = vmatmul.msk.f32.vlgmr.msra.gmra.mxu1 %vm143_vm2, %v102_v4  ;;  %v191_v15 = vld [vmem:[#allocation5 + $0x38] sm:$0xff]  ;;  %v189_v17 = vld [vmem:[#allocation5 + $0x28] sm:$0xff] }
  0x19   :  { %205 = vmatpush.msra.mxu2 %v198_v6  ;;  %v194_v12 = vld [vmem:[#allocation5 + $0x50] sm:$0xff]  ;;  %v188_v18 = vld [vmem:[#allocation5 + $0x20] sm:$0xff]  ;;  %v187_v19 = vld [vmem:[#allocation5 + $0x18] sm:$0xff] }
  0x1a   :  { %v190_v16 = vld [vmem:[#allocation5 + $0x30] sm:$0xff]  ;;  %v185_v21 = vld [vmem:[#allocation5 + $0x8] sm:$0xff]  ;;  %v184_v22 = vld [vmem:[#allocation5] sm:$0xff] }
  0x1b   :  { %206 = vmatpush.msra.mxu2 %v197_v7  ;;  %v186_v20 = vld [vmem:[#allocation5 + $0x10] sm:$0xff]  ;;  %v244_v23 = vld [vmem:[#allocation7 + $0x78] sm:$0xff]  ;;  %v242_v25 = vld [vmem:[#allocation7 + $0x68] sm:$0xff] }
  0x1c   :  { %v243_v24 = vld [vmem:[#allocation7 + $0x70] sm:$0xff]  ;;  %249 = vmatpush.msra.mxu3 %v244_v23  ;;  %v241_v26 = vld [vmem:[#allocation7 + $0x60] sm:$0xff]  ;;  %v240_v27 = vld [vmem:[#allocation7 + $0x58] sm:$0xff] }
  0x1d   :  { %207 = vmatpush.msra.mxu2 %v196_v8  ;;  %v239_v28 = vld [vmem:[#allocation7 + $0x50] sm:$0xff]  ;;  %v238_v29 = vld [vmem:[#allocation7 + $0x48] sm:$0xff]  ;;  %v237_v30 = vld [vmem:[#allocation7 + $0x40] sm:$0xff] }
  0x1e   :  { %250 = vmatpush.msra.mxu3 %v243_v24  ;;  %v236_v31 = vld [vmem:[#allocation7 + $0x38] sm:$0xff]  ;;  %v369_v33 = vld [vmem:[%s633_s4] ss:$0 sm:$0xff]  ;;  %v234_v37 = vld [vmem:[#allocation7 + $0x28] sm:$0xff] }
  0x1f   :  { %342 = vmatmul.msk.f32.gmra.mxu0 %vm109_vm1, %v107_v9  ;;  %208 = vmatpush.msra.mxu2 %v195_v10  ;;  %v235_v34 = vld [vmem:[#allocation7 + $0x30] sm:$0xff]  ;;  %v233_v39 = vld [vmem:[#allocation7 + $0x20] sm:$0xff]  ;;  %v232_v41 = vld [vmem:[#allocation7 + $0x18] sm:$0xff] }
  0x20   :  { %345 = vmatmul.msk.f32.gmra.mxu1 %vm143_vm2, %v103_v11  ;;  %251 = vmatpush.msra.mxu3 %v242_v25  ;;  %v231_v47 = vld [vmem:[#allocation7 + $0x10] sm:$0xff]  ;;  %v230_v48 = vld [vmem:[#allocation7 + $0x8] sm:$0xff]  ;;  %v229_v49 = vld [vmem:[#allocation7] sm:$0xff] }
  0x21   :  { %209 = vmatpush.msra.mxu2 %v194_v12  ;;  %v289_v50 = vld [vmem:[#allocation8 + $0x78] sm:$0xff]  ;;  %v288_v51 = vld [vmem:[#allocation8 + $0x70] sm:$0xff]  ;;  %v287_v52 = vld [vmem:[#allocation8 + $0x68] sm:$0xff] }
  0x22   :  { %252 = vmatpush.msra.mxu3 %v241_v26  ;;  %294 = vmatpush.msrb.mxu0 %v289_v50  ;;  %v286_v53 = vld [vmem:[#allocation8 + $0x60] sm:$0xff]  ;;  %v285_v54 = vld [vmem:[#allocation8 + $0x58] sm:$0xff]  ;;  %v284_v55 = vld [vmem:[#allocation8 + $0x50] sm:$0xff] }
  0x23   :  { %210 = vmatpush.msra.mxu2 %v193_v13  ;;  %346 = vmatpush.msrb.mxu1 %v289_v50  ;;  %v283_v56 = vld [vmem:[#allocation8 + $0x48] sm:$0xff]  ;;  %v282_v57 = vld [vmem:[#allocation8 + $0x40] sm:$0xff]  ;;  %v281_v58 = vld [vmem:[#allocation8 + $0x38] sm:$0xff] }
  0x24   :  { %253 = vmatpush.msra.mxu3 %v240_v27  ;;  %295 = vmatpush.msrb.mxu0 %v288_v51  ;;  %v370_v59 = vld [vmem:[%s635_s6] ss:$0 sm:$0xff]  ;;  %v279_v61 = vld [vmem:[#allocation8 + $0x28] sm:$0xff]  ;;  %v278_v0 = vld [vmem:[#allocation8 + $0x20] sm:$0xff] }
  0x25   :  { %211 = vmatpush.msra.mxu2 %v192_v14  ;;  %347 = vmatpush.msrb.mxu1 %v288_v51  ;;  %v280_v60 = vld [vmem:[#allocation8 + $0x30] sm:$0xff]  ;;  %v277_v2 = vld [vmem:[#allocation8 + $0x18] sm:$0xff]  ;;  %v275_v7 = vld [vmem:[#allocation8 + $0x8] sm:$0xff] }
  0x26   :  { %254 = vmatpush.msra.mxu3 %v239_v28  ;;  %296 = vmatpush.msrb.mxu0 %v287_v52  ;;  %v276_v6 = vld [vmem:[#allocation8 + $0x10] sm:$0xff]  ;;  %v274_v8 = vld [vmem:[#allocation8] sm:$0xff] }
  0x27   :  { %212 = vmatpush.msra.mxu2 %v191_v15  ;;  %348 = vmatpush.msrb.mxu1 %v287_v52  ;;  %v371_v9 = vld [vmem:[%s637_s8] ss:$0 sm:$0xff]  ;;  %s325_s8 = sshll.u32 %s640_s11, 4  ;;  %s326_s8 = int_to_ptr.hbm [resolvable:$true] %s325_s8 }
  0x28   :  { %255 = vmatpush.msra.mxu3 %v238_v29  ;;  %297 = vmatpush.msrb.mxu0 %v286_v53 }
  0x29   :  { %213 = vmatpush.msra.mxu2 %v190_v16  ;;  %349 = vmatpush.msrb.mxu1 %v286_v53  ;;  %v372_v16 = vld [vmem:[%s639_s10] ss:$0 sm:$0xff] }
  0x2a   :  { %256 = vmatpush.msra.mxu3 %v237_v30  ;;  %298 = vmatpush.msrb.mxu0 %v285_v54 }
  0x2b   :  { %214 = vmatpush.msra.mxu2 %v189_v17  ;;  %350 = vmatpush.msrb.mxu1 %v285_v54 }
  0x2c   :  { %257 = vmatpush.msra.mxu3 %v236_v31  ;;  %299 = vmatpush.msrb.mxu0 %v284_v55 }
  0x2d   :  { %215 = vmatpush.msra.mxu2 %v188_v18  ;;  %351 = vmatpush.msrb.mxu1 %v284_v55 }
  0x2e   :  { %258 = vmatpush.msra.mxu3 %v235_v34  ;;  %300 = vmatpush.msrb.mxu0 %v283_v56 }
  0x2f   :  { %216 = vmatpush.msra.mxu2 %v187_v19  ;;  %352 = vmatpush.msrb.mxu1 %v283_v56 }
  0x30   :  { %259 = vmatpush.msra.mxu3 %v234_v37  ;;  %301 = vmatpush.msrb.mxu0 %v282_v57 }
  0x31   :  { %217 = vmatpush.msra.mxu2 %v186_v20  ;;  %353 = vmatpush.msrb.mxu1 %v282_v57 }
  0x32   :  { %260 = vmatpush.msra.mxu3 %v233_v39  ;;  %302 = vmatpush.msrb.mxu0 %v281_v58 }
  0x33   :  { %218 = vmatpush.msra.mxu2 %v185_v21  ;;  %354 = vmatpush.msrb.mxu1 %v281_v58 }
  0x34   :  { %261 = vmatpush.msra.mxu3 %v232_v41  ;;  %303 = vmatpush.msrb.mxu0 %v280_v60 }
  0x35   :  { %219 = vmatpush.msra.mxu2 %v184_v22  ;;  %355 = vmatpush.msrb.mxu1 %v280_v60 }
  0x36   :  { %262 = vmatpush.msra.mxu3 %v231_v47  ;;  %304 = vmatpush.msrb.mxu0 %v279_v61 }
  0x37   :  { %356 = vmatpush.msrb.mxu1 %v279_v61 }
  0x38   :  { %263 = vmatpush.msra.mxu3 %v230_v48  ;;  %305 = vmatpush.msrb.mxu0 %v278_v0 }
  0x39   :  { %357 = vmatpush.msrb.mxu1 %v278_v0 }
  0x3a   :  { %264 = vmatpush.msra.mxu3 %v229_v49  ;;  %306 = vmatpush.msrb.mxu0 %v277_v2 }
  0x3b   :  { %358 = vmatpush.msrb.mxu1 %v277_v2 }
  0x3c   :  { %307 = vmatpush.msrb.mxu0 %v276_v6 }
  0x3d   :  { %359 = vmatpush.msrb.mxu1 %v276_v6 }
  0x3e   :  { %308 = vmatpush.msrb.mxu0 %v275_v7 }
  0x3f   :  { %360 = vmatpush.msrb.mxu1 %v275_v7 }
  0x40   :  { %309 = vmatpush.msrb.mxu0 %v274_v8 }
  0x41   :  { %361 = vmatpush.msrb.mxu1 %v274_v8 }
  0x94   :  { %v137_v32 = vpop.f32.mrf.mxu0 }
  0x95   :  { %v170_v35 = vpop.f32.mrf.mxu1 }
  0x96   :  { %v171_v36 = vadd.f32 %v170_v35, %v137_v32 }
  0x98   :  { %v180_v38 = vadd.f32 %v369_v33, %v171_v36 }
  0x9a   :  { %v182_v40 = vmax.f32 %v180_v38, 0.0 }
  0x9c   :  { %v140_v42 = vpop.f32.mrf.mxu0  ;;  %220 = vmatmul.f32.vlgmr.msra.gmra.mxu2 %v182_v40 }
  0x9d   :  { %v173_v43 = vpop.f32.mrf.mxu1 }
  0x9e   :  { %v174_v44 = vadd.f32 %v173_v43, %v140_v42 }
  0xa0   :  { %v181_v45 = vadd.f32 %v369_v33, %v174_v44 }
  0xa2   :  { %v183_v46 = vmax.f32 %v181_v45, 0.0 }
  0xa4   :  { %223 = vmatmul.f32.gmra.mxu2 %v183_v46 }
 0x11f   :  { %v221_v62 = vpop.f32.mrf.mxu2 }
 0x120   :  { %v222_v63 = vadd.f32 %v370_v59, %v221_v62 }
 0x122   :  { %v227_v1 = vmax.f32 %v222_v63, 0.0 }
 0x124   :  { %265 = vmatmul.f32.vlgmr.msra.gmra.mxu3 %v227_v1 }
 0x127   :  { %v224_v3 = vpop.f32.mrf.mxu2 }
 0x128   :  { %v225_v4 = vadd.f32 %v370_v59, %v224_v3 }
 0x12a   :  { %v228_v5 = vmax.f32 %v225_v4, 0.0 }
 0x12c   :  { %268 = vmatmul.f32.gmra.mxu3 %v228_v5 }
 0x1a7   :  { %v266_v10 = vpop.f32.mrf.mxu3 }
 0x1a8   :  { %v267_v11 = vadd.f32 %v371_v9, %v266_v10 }
 0x1aa   :  { %v272_v12 = vmax.f32 %v267_v11, 0.0 }
 0x1ac   :  { %310 = vmatmul.f32.vlgmr.msrb.gmra.mxu0 %v272_v12 }
 0x1af   :  { %v269_v13 = vpop.f32.mrf.mxu3 }
 0x1b0   :  { %v270_v14 = vadd.f32 %v371_v9, %v269_v13 }
 0x1b2   :  { %v273_v15 = vmax.f32 %v270_v14, 0.0 }
 0x1b4   :  { %313 = vmatmul.f32.vlgmr.msrb.gmra.mxu1 %v273_v15 }
 0x229   :  { %v311_v17 = vpop.f32.mrf.mxu0 }
 0x22a   :  { %v312_v18 = vadd.f32 %v372_v16, %v311_v17 }
 0x22c   :  { %317 = vst [vmem:[#allocation10] sm:$0xff] %v312_v18 }
 0x231   :  { %v314_v19 = vpop.f32.mrf.mxu1 }
 0x232   :  { %v315_v20 = vadd.f32 %v372_v16, %v314_v19 }
 0x234   :  { %318 = vst [vmem:[#allocation10 + $0x8] sm:$0xff] %v315_v20 }
 0x235   :  { %331 = dma.vmem_to_hbm [thread:$0]  %s324_s2, 256, %s326_s8, [#allocation4], %s502_s25, %s502_s25, %s503_s26  }
 0x236   :  { %499 = dma.done.wait [#allocation4], 256  }
 0x237   :  { %500 = vsyncadd [#allocation4], 4294967040 }
 0x238   :  { %336 = vsyncpa [#allocation3], 1 }
 0x239   :  { %337 = vsyncpa [#allocation6], 1 }
 0x23a   :  { %338 = vsyncpa [#allocation9], 1 }
 0x23b   :  { %339 = vsyncpa [#allocation4], 1 }

</bundles_post_ra>
